<compile_context>
chip_gen: v7x
topology: tpu7x:2x2x1
jax: 0.10.0
libtpu: 0.0.40
codegen_flags: <defaults>
</compile_context>

<pallas_src>
import functools

import jax
import jax.numpy as jnp
from jax.experimental import pallas as pl
from jax.experimental.pallas import tpu as pltpu


_LANES = 128
_UNROLL_C_MAX = 32  # unroll the class loop for typical segmentation class counts


def _focal_loss_kernel(x_ref, t_ref, out_ref, *, c, gamma, alpha, hw, s_tile,
                       hw_inner, masked):
    # x_ref:   (C, S, 128) logits block (input dtype, upcast per class)
    # t_ref:   (S, 128)    int32 targets
    # out_ref: (S, 128)    f32 per-(batch, hw_outer) accumulator
    jo = pl.program_id(1)
    ji = pl.program_id(2)

    @pl.when(ji == 0)
    def _():
        out_ref[...] = jnp.zeros_like(out_ref)

    t = t_ref[...]

    if c <= _UNROLL_C_MAX:
        # Pass 1: running max over classes — dense (S,128) VPU ops.
        m = x_ref[0].astype(jnp.float32)
        for cc in range(1, c):
            m = jnp.maximum(m, x_ref[cc].astype(jnp.float32))
        # Pass 2: softmax denominator + fused gather at the target class.
        sumexp = jnp.zeros_like(m)
        z_t = jnp.zeros_like(m)
        e_t = jnp.zeros_like(m)
        a_t = jnp.zeros_like(m) if alpha is not None else None
        for cc in range(c):
            z_c = x_ref[cc].astype(jnp.float32) - m
            e_c = jnp.exp(z_c)
            sumexp = sumexp + e_c
            sel = t == cc
            z_t = jnp.where(sel, z_c, z_t)
            e_t = jnp.where(sel, e_c, e_t)
            if alpha is not None:
                a_t = jnp.where(sel, jnp.float32(alpha[cc]), a_t)
    else:
        # Large class counts: vectorized leading-axis reduce (last two dims dense).
        x = x_ref[...].astype(jnp.float32)                       # (C, S, 128)
        m = jnp.max(x, axis=0)
        z = x - m[None]
        e = jnp.exp(z)
        sumexp = jnp.sum(e, axis=0)
        sel = jax.lax.broadcasted_iota(jnp.int32, x.shape, 0) == t[None]
        z_t = jnp.sum(jnp.where(sel, z, 0.0), axis=0)
        e_t = jnp.sum(jnp.where(sel, e, 0.0), axis=0)
        if alpha is not None:
            a_vec = jnp.asarray(alpha, jnp.float32).reshape(c, 1, 1)
            a_t = jnp.sum(jnp.where(sel, a_vec, 0.0), axis=0)
        else:
            a_t = None

    lse = jnp.log(sumexp)                 # one T-wide EUP log per tile
    logpt = z_t - lse
    pt = e_t / sumexp                     # reuses softmax exps; no exp(logpt)

    logpt_w = logpt * a_t if alpha is not None else logpt

    u = 1.0 - pt
    g = float(gamma)
    if g == int(g) and 0 <= int(g) <= 16:
        # Integer gamma: exponentiation by squaring on the VPU (no pow on EUP).
        e_int = int(g)
        if e_int == 0:
            focal = jnp.ones_like(u)
        else:
            focal = None
            base = u
            while e_int:
                if e_int & 1:
                    focal = base if focal is None else focal * base
                e_int >>= 1
                if e_int:
                    base = base * base
    else:
        # 1 - pt can round slightly negative; clamp to avoid NaN from ** g.
        focal = jnp.power(jnp.maximum(u, 0.0), g)
    loss = -focal * logpt_w

    if masked:
        is_last = (jo == pl.num_programs(1) - 1) & (ji == pl.num_programs(2) - 1)

        @pl.when(is_last)
        def _():
            # Only the final tile contains padded / out-of-bounds pixels.
            row = ((jo * hw_inner + ji) * s_tile
                   + jax.lax.broadcasted_iota(jnp.int32, loss.shape, 0))
            pos = row * _LANES + jax.lax.broadcasted_iota(jnp.int32, loss.shape, 1)
            out_ref[...] += jnp.where(pos < hw, loss, 0.0)   # select, not mul-by-0

        @pl.when(jnp.logical_not(is_last))
        def _():
            out_ref[...] += loss
    else:
        out_ref[...] += loss


def _vmem_capacity_bytes():
    """Physical VMEM per core; conservative (v7x) fallback if unavailable."""
    try:
        info = pltpu.get_tpu_info()
        cap = int(getattr(info, "vmem_capacity_bytes", 0) or 0)
        if cap > 0:
            return cap
    except Exception:
        pass
    return 64 << 20


def _pick_row_tile(rows, c, itemsize, vmem_capacity):
    """Rows (of 128 lanes) per block: ~2 MiB of logits, chip-aware VMEM bound."""
    if rows <= 8:
        return rows                                     # tiny input: single full tile
    target_bytes = 2 << 20                              # ~2 MiB logits block
    s_tgt = (target_bytes // (c * _LANES * itemsize)) // 8 * 8
    # Working set: double-buffered logits + targets + accumulator, plus ~8 f32
    # per-pixel temporaries the compiler keeps in VMEM for large blocks.
    per_row = (2 * c * itemsize + 2 * 4 + 2 * 4 + 8 * 4) * _LANES
    s_cap = ((vmem_capacity // 4) // per_row) // 8 * 8
    s = max(8, min(s_tgt, s_cap))
    if rows <= s:
        return rows                                     # equals full dim (legal block)
    return s


def focal_loss(logits, target, gamma=2, alpha=None, size_average=True):
    """Focal loss matching the PyTorch FocalLoss.forward. Returns a scalar."""
    if logits.ndim > 2:
        n, c = int(logits.shape[0]), int(logits.shape[1])
        x = logits.reshape(n, c, -1)                    # (N, C, HW) -- free reshape
        t = target.reshape(n, -1).astype(jnp.int32)     # (N, HW)
    else:
        m_rows, c = int(logits.shape[0]), int(logits.shape[1])
        n = 1
        x = logits.T.reshape(1, c, m_rows)              # rare 2-D path: one transpose
        t = target.reshape(1, m_rows).astype(jnp.int32)
    hw = int(x.shape[2])

    # Normalize alpha the way the PyTorch module does (float -> [a, 1-a]; list -> tensor).
    if alpha is not None:
        if isinstance(alpha, (float, int)) and not isinstance(alpha, bool):
            a_list = [float(alpha), 1.0 - float(alpha)]
        else:
            a_list = [float(v) for v in alpha]
        a_list = (a_list + [1.0] * c)[:c]   # pad with neutral 1.0 / truncate to C
        alpha_t = tuple(a_list)
    else:
        alpha_t = None

    # Reshape HW -> (rows, 128): per-pixel tensors become lane- AND sublane-dense.
    rows = pl.cdiv(hw, _LANES)
    hw_pad = rows * _LANES
    if hw_pad != hw:
        # Pad only to the next lane multiple (<=127 pixels); masked in-kernel.
        x = jnp.pad(x, ((0, 0), (0, 0), (0, hw_pad - hw)))
        t = jnp.pad(t, ((0, 0), (0, hw_pad - hw)))
    x4 = x.reshape(n, c, rows, _LANES)
    t4 = t.reshape(n, rows, _LANES)
    # TODO(synk): int8 targets / bf16 logits would further shrink the HBM streams
    # on memory-bound v5e/v6e (the kernel already upcasts per class).

    vmem_cap = _vmem_capacity_bytes()
    s_tile = _pick_row_tile(rows, c, x4.dtype.itemsize, vmem_cap)
    num_row_tiles = pl.cdiv(rows, s_tile)
    masked = (hw_pad != hw) or (num_row_tiles * s_tile != rows)

    # Second "parallel" axis over row tiles so v7x's two TensorCores both get
    # work when the batch is tiny (neutral on single-core v5e/v6e).
    if n < 2 and num_row_tiles >= 2 and num_row_tiles % 2 == 0:
        hw_outer = 2
    else:
        hw_outer = 1
    hw_inner = num_row_tiles // hw_outer
    grid = (n, hw_outer, hw_inner)

    kernel = functools.partial(
        _focal_loss_kernel, c=c, gamma=gamma, alpha=alpha_t, hw=hw,
        s_tile=s_tile, hw_inner=hw_inner, masked=masked)

    flops = n * hw * (6 * c + 12)
    transcendentals = n * hw * (c + 2)
    bytes_accessed = (n * c * rows * _LANES * x4.dtype.itemsize
                      + n * rows * _LANES * 4
                      + n * hw_outer * s_tile * _LANES * 4)

    partial_sums = pl.pallas_call(
        kernel,
        out_shape=jax.ShapeDtypeStruct((n, hw_outer, s_tile, _LANES), jnp.float32),
        grid_spec=pltpu.PrefetchScalarGridSpec(
            num_scalar_prefetch=0,
            grid=grid,
            in_specs=[
                pl.BlockSpec((None, c, s_tile, _LANES),
                             lambda i, jo, ji: (i, 0, jo * hw_inner + ji, 0)),
                pl.BlockSpec((None, s_tile, _LANES),
                             lambda i, jo, ji: (i, jo * hw_inner + ji, 0)),
            ],
            out_specs=pl.BlockSpec((None, None, s_tile, _LANES),
                                   lambda i, jo, ji: (i, jo, 0, 0)),
        ),
        compiler_params=pltpu.CompilerParams(
            dimension_semantics=("parallel", "parallel", "arbitrary"),
            vmem_limit_bytes=int(min(64 << 20, vmem_cap // 2)),
        ),
        cost_estimate=pl.CostEstimate(
            flops=int(flops),
            transcendentals=int(transcendentals),
            bytes_accessed=int(bytes_accessed)),
    )(x4, t4)

    loss_sum = jnp.sum(partial_sums)   # tiny final reduce outside the kernel
    if size_average:
        return loss_sum / jnp.float32(n * hw)
    return loss_sum


def _reference(logits, target, gamma=2, alpha=None, size_average=True):
    """Pure-JAX mirror of the PyTorch module for correctness checking."""
    if logits.ndim > 2:
        n, c = logits.shape[0], logits.shape[1]
        x = logits.reshape(n, c, -1).transpose(0, 2, 1).reshape(-1, c)
    else:
        x = logits
    t = target.reshape(-1).astype(jnp.int32)
    logp = jax.nn.log_softmax(x, axis=-1)
    logpt = jnp.take_along_axis(logp, t[:, None], axis=1)[:, 0]
    pt = jnp.exp(logpt)
    if alpha is not None:
        if isinstance(alpha, (float, int)) and not isinstance(alpha, bool):
            a = jnp.array([alpha, 1.0 - alpha], jnp.float32)
        else:
            a = jnp.asarray(alpha, jnp.float32)
        logpt = logpt * a[t]
    loss = -1.0 * (1.0 - pt) ** gamma * logpt
    return loss.mean() if size_average else loss.sum()


if __name__ == "__main__":
    key = jax.random.PRNGKey(0)
    k1, k2, k3, k4, k5, k6 = jax.random.split(key, 6)

    # Case 1: lane-aligned spatial size, gamma=2, mean reduction.
    N, C, H, W = 2, 4, 16, 16
    logits = jax.random.normal(k1, (N, C, H, W), dtype=jnp.float32)
    target = jax.random.randint(k2, (N, H, W), 0, C, dtype=jnp.int32)
    out = jax.block_until_ready(focal_loss(logits, target))
    ref = _reference(logits, target)
    assert jnp.allclose(out, ref, rtol=1e-5, atol=1e-6), (out, ref)

    # Case 2: ragged spatial size (exercises the pl.when-gated tail mask).
    N2, C2, H2, W2 = 2, 3, 10, 7
    logits2 = jax.random.normal(k3, (N2, C2, H2, W2), dtype=jnp.float32)
    target2 = jax.random.randint(k4, (N2, H2, W2), 0, C2, dtype=jnp.int32)
    out2 = jax.block_until_ready(focal_loss(logits2, target2))
    ref2 = _reference(logits2, target2)
    assert jnp.allclose(out2, ref2, rtol=1e-5, atol=1e-6), (out2, ref2)

    # Case 3: float alpha (binary weighting) + sum reduction.
    N3, C3, H3, W3 = 2, 2, 12, 12
    logits3 = jax.random.normal(k5, (N3, C3, H3, W3), dtype=jnp.float32)
    target3 = jax.random.randint(k6, (N3, H3, W3), 0, C3, dtype=jnp.int32)
    out3 = jax.block_until_ready(
        focal_loss(logits3, target3, gamma=2, alpha=0.25, size_average=False))
    ref3 = _reference(logits3, target3, gamma=2, alpha=0.25, size_average=False)
    assert jnp.allclose(out3, ref3, rtol=1e-5, atol=1e-5), (out3, ref3)

    print("KERNEL_OK")
</pallas_src>

<mosaic_0001>
module attributes {stable_mosaic.version = 11 : i64} {
  func.func @_focal_loss_kernel(%arg0: i32, %arg1: i32, %arg2: i32, %arg3: memref<1x4x2x128xf32, #tpu.memory_space<vmem>>, %arg4: memref<1x2x128xi32, #tpu.memory_space<vmem>>, %arg5: memref<1x1x2x128xf32, #tpu.memory_space<vmem>>) attributes {dimension_semantics = [#tpu.dimension_semantics<parallel>, #tpu.dimension_semantics<parallel>, #tpu.dimension_semantics<arbitrary>], iteration_bounds = array<i64: 2, 1, 1>, scalar_prefetch = 0 : i64, scratch_operands = 0 : i64, tpu.core_type = #tpu.core_type<tc>, window_params = [{transform_indices = @transform_0, window_bounds = array<i64: 1, 4, 2, 128>}, {transform_indices = @transform_1, window_bounds = array<i64: 1, 2, 128>}, {transform_indices = @transform_2, window_bounds = array<i64: 1, 1, 2, 128>}]} {
    %c0_i32 = arith.constant 0 : i32
    %0 = arith.cmpi eq, %arg2, %c0_i32 : i32
    %1 = arith.extui %0 : i1 to i32
    %c0_i32_0 = arith.constant 0 : i32
    %2 = arith.cmpi ne, %1, %c0_i32_0 : i32
    scf.if %2 {
      %cst_45 = arith.constant 0.000000e+00 : f32
      %70 = vector.broadcast %cst_45 : f32 to vector<2x128xf32>
      %c0_46 = arith.constant 0 : index
      %c0_47 = arith.constant 0 : index
      %c0_48 = arith.constant 0 : index
      %c0_49 = arith.constant 0 : index
      %71 = vector.load %arg5[%c0_46, %c0_47, %c0_48, %c0_49] : memref<1x1x2x128xf32, #tpu.memory_space<vmem>>, vector<1x1x2x128xf32>
      %72 = vector.shape_cast %71 : vector<1x1x2x128xf32> to vector<2x128xf32>
      %73 = vector.shape_cast %70 : vector<2x128xf32> to vector<1x1x2x128xf32>
      tpu.vector_store %arg5[%c0_46, %c0_47, %c0_48, %c0_49], %73 {strides = array<i32>} : memref<1x1x2x128xf32, #tpu.memory_space<vmem>>, vector<1x1x2x128xf32>,
    } else {
    }
    %c0 = arith.constant 0 : index
    %c0_1 = arith.constant 0 : index
    %c0_2 = arith.constant 0 : index
    %3 = vector.load %arg4[%c0, %c0_1, %c0_2] : memref<1x2x128xi32, #tpu.memory_space<vmem>>, vector<1x2x128xi32>
    %4 = vector.shape_cast %3 : vector<1x2x128xi32> to vector<2x128xi32>
    %c0_3 = arith.constant 0 : index
    %c0_4 = arith.constant 0 : index
    %c0_5 = arith.constant 0 : index
    %c0_6 = arith.constant 0 : index
    %5 = vector.load %arg3[%c0_3, %c0_4, %c0_5, %c0_6] : memref<1x4x2x128xf32, #tpu.memory_space<vmem>>, vector<1x1x2x128xf32>
    %6 = vector.shape_cast %5 : vector<1x1x2x128xf32> to vector<2x128xf32>
    %c0_7 = arith.constant 0 : index
    %c1 = arith.constant 1 : index
    %c0_8 = arith.constant 0 : index
    %c0_9 = arith.constant 0 : index
    %7 = vector.load %arg3[%c0_7, %c1, %c0_8, %c0_9] : memref<1x4x2x128xf32, #tpu.memory_space<vmem>>, vector<1x1x2x128xf32>
    %8 = vector.shape_cast %7 : vector<1x1x2x128xf32> to vector<2x128xf32>
    %9 = arith.maximumf %6, %8 : vector<2x128xf32>
    %c0_10 = arith.constant 0 : index
    %c2 = arith.constant 2 : index
    %c0_11 = arith.constant 0 : index
    %c0_12 = arith.constant 0 : index
    %10 = vector.load %arg3[%c0_10, %c2, %c0_11, %c0_12] : memref<1x4x2x128xf32, #tpu.memory_space<vmem>>, vector<1x1x2x128xf32>
    %11 = vector.shape_cast %10 : vector<1x1x2x128xf32> to vector<2x128xf32>
    %12 = arith.maximumf %9, %11 : vector<2x128xf32>
    %c0_13 = arith.constant 0 : index
    %c3 = arith.constant 3 : index
    %c0_14 = arith.constant 0 : index
    %c0_15 = arith.constant 0 : index
    %13 = vector.load %arg3[%c0_13, %c3, %c0_14, %c0_15] : memref<1x4x2x128xf32, #tpu.memory_space<vmem>>, vector<1x1x2x128xf32>
    %14 = vector.shape_cast %13 : vector<1x1x2x128xf32> to vector<2x128xf32>
    %15 = arith.maximumf %12, %14 : vector<2x128xf32>
    %cst = arith.constant 0.000000e+00 : f32
    %16 = vector.broadcast %cst : f32 to vector<2x128xf32>
    %cst_16 = arith.constant 0.000000e+00 : f32
    %17 = vector.broadcast %cst_16 : f32 to vector<2x128xf32>
    %cst_17 = arith.constant 0.000000e+00 : f32
    %18 = vector.broadcast %cst_17 : f32 to vector<2x128xf32>
    %c0_18 = arith.constant 0 : index
    %c0_19 = arith.constant 0 : index
    %c0_20 = arith.constant 0 : index
    %c0_21 = arith.constant 0 : index
    %19 = vector.load %arg3[%c0_18, %c0_19, %c0_20, %c0_21] : memref<1x4x2x128xf32, #tpu.memory_space<vmem>>, vector<1x1x2x128xf32>
    %20 = vector.shape_cast %19 : vector<1x1x2x128xf32> to vector<2x128xf32>
    %21 = arith.subf %20, %15 : vector<2x128xf32>
    %22 = math.exp %21 : vector<2x128xf32>
    %23 = arith.addf %16, %22 : vector<2x128xf32>
    %c0_i32_22 = arith.constant 0 : i32
    %24 = vector.broadcast %c0_i32_22 : i32 to vector<2x128xi32>
    %25 = arith.cmpi eq, %4, %24 : vector<2x128xi32>
    %26 = arith.select %25, %21, %17 : vector<2x128xi1>, vector<2x128xf32>
    %27 = arith.select %25, %22, %18 : vector<2x128xi1>, vector<2x128xf32>
    %c0_23 = arith.constant 0 : index
    %c1_24 = arith.constant 1 : index
    %c0_25 = arith.constant 0 : index
    %c0_26 = arith.constant 0 : index
    %28 = vector.load %arg3[%c0_23, %c1_24, %c0_25, %c0_26] : memref<1x4x2x128xf32, #tpu.memory_space<vmem>>, vector<1x1x2x128xf32>
    %29 = vector.shape_cast %28 : vector<1x1x2x128xf32> to vector<2x128xf32>
    %30 = arith.subf %29, %15 : vector<2x128xf32>
    %31 = math.exp %30 : vector<2x128xf32>
    %32 = arith.addf %23, %31 : vector<2x128xf32>
    %c1_i32 = arith.constant 1 : i32
    %33 = vector.broadcast %c1_i32 : i32 to vector<2x128xi32>
    %34 = arith.cmpi eq, %4, %33 : vector<2x128xi32>
    %35 = arith.select %34, %30, %26 : vector<2x128xi1>, vector<2x128xf32>
    %36 = arith.select %34, %31, %27 : vector<2x128xi1>, vector<2x128xf32>
    %c0_27 = arith.constant 0 : index
    %c2_28 = arith.constant 2 : index
    %c0_29 = arith.constant 0 : index
    %c0_30 = arith.constant 0 : index
    %37 = vector.load %arg3[%c0_27, %c2_28, %c0_29, %c0_30] : memref<1x4x2x128xf32, #tpu.memory_space<vmem>>, vector<1x1x2x128xf32>
    %38 = vector.shape_cast %37 : vector<1x1x2x128xf32> to vector<2x128xf32>
    %39 = arith.subf %38, %15 : vector<2x128xf32>
    %40 = math.exp %39 : vector<2x128xf32>
    %41 = arith.addf %32, %40 : vector<2x128xf32>
    %c2_i32 = arith.constant 2 : i32
    %42 = vector.broadcast %c2_i32 : i32 to vector<2x128xi32>
    %43 = arith.cmpi eq, %4, %42 : vector<2x128xi32>
    %44 = arith.select %43, %39, %35 : vector<2x128xi1>, vector<2x128xf32>
    %45 = arith.select %43, %40, %36 : vector<2x128xi1>, vector<2x128xf32>
    %c0_31 = arith.constant 0 : index
    %c3_32 = arith.constant 3 : index
    %c0_33 = arith.constant 0 : index
    %c0_34 = arith.constant 0 : index
    %46 = vector.load %arg3[%c0_31, %c3_32, %c0_33, %c0_34] : memref<1x4x2x128xf32, #tpu.memory_space<vmem>>, vector<1x1x2x128xf32>
    %47 = vector.shape_cast %46 : vector<1x1x2x128xf32> to vector<2x128xf32>
    %48 = arith.subf %47, %15 : vector<2x128xf32>
    %49 = math.exp %48 : vector<2x128xf32>
    %50 = arith.addf %41, %49 : vector<2x128xf32>
    %c3_i32 = arith.constant 3 : i32
    %51 = vector.broadcast %c3_i32 : i32 to vector<2x128xi32>
    %52 = arith.cmpi eq, %4, %51 : vector<2x128xi32>
    %53 = arith.select %52, %48, %44 : vector<2x128xi1>, vector<2x128xf32>
    %54 = arith.select %52, %49, %45 : vector<2x128xi1>, vector<2x128xf32>
    %55 = math.log %50 : vector<2x128xf32>
    %56 = arith.subf %53, %55 : vector<2x128xf32>
    %57 = arith.divf %54, %50 : vector<2x128xf32>
    %cst_35 = arith.constant 1.000000e+00 : f32
    %58 = vector.broadcast %cst_35 : f32 to vector<2x128xf32>
    %59 = arith.subf %58, %57 : vector<2x128xf32>
    %60 = arith.mulf %59, %59 : vector<2x128xf32>
    %cst_36 = arith.constant 0.000000e+00 : f32
    %61 = vector.broadcast %cst_36 : f32 to vector<2x128xf32>
    %62 = arith.subf %61, %60 : vector<2x128xf32>
    %63 = arith.mulf %62, %56 : vector<2x128xf32>
    %c0_37 = arith.constant 0 : index
    %c0_38 = arith.constant 0 : index
    %c0_39 = arith.constant 0 : index
    %c0_40 = arith.constant 0 : index
    %64 = vector.load %arg5[%c0_37, %c0_38, %c0_39, %c0_40] : memref<1x1x2x128xf32, #tpu.memory_space<vmem>>, vector<1x1x2x128xf32>
    %65 = vector.shape_cast %64 : vector<1x1x2x128xf32> to vector<2x128xf32>
    %66 = arith.addf %65, %63 : vector<2x128xf32>
    %c0_41 = arith.constant 0 : index
    %c0_42 = arith.constant 0 : index
    %c0_43 = arith.constant 0 : index
    %c0_44 = arith.constant 0 : index
    %67 = vector.load %arg5[%c0_41, %c0_42, %c0_43, %c0_44] : memref<1x1x2x128xf32, #tpu.memory_space<vmem>>, vector<1x1x2x128xf32>
    %68 = vector.shape_cast %67 : vector<1x1x2x128xf32> to vector<2x128xf32>
    %69 = vector.shape_cast %66 : vector<2x128xf32> to vector<1x1x2x128xf32>
    tpu.vector_store %arg5[%c0_41, %c0_42, %c0_43, %c0_44], %69 {strides = array<i32>} : memref<1x1x2x128xf32, #tpu.memory_space<vmem>>, vector<1x1x2x128xf32>,
    return
  }
  func.func @transform_0(%arg0: i32, %arg1: i32, %arg2: i32) -> (i32, i32, i32, i32) {
    %c1_i32 = arith.constant 1 : i32
    %0 = arith.muli %arg1, %c1_i32 : i32
    %1 = arith.addi %0, %arg2 : i32
    %c0_i32 = arith.constant 0 : i32
    %c0_i32_0 = arith.constant 0 : i32
    %c0_i32_1 = arith.constant 0 : i32
    return %arg0, %c0_i32, %1, %c0_i32_0 : i32, i32, i32, i32
  }
  func.func @transform_1(%arg0: i32, %arg1: i32, %arg2: i32) -> (i32, i32, i32) {
    %c1_i32 = arith.constant 1 : i32
    %0 = arith.muli %arg1, %c1_i32 : i32
    %1 = arith.addi %0, %arg2 : i32
    %c0_i32 = arith.constant 0 : i32
    %c0_i32_0 = arith.constant 0 : i32
    return %arg0, %1, %c0_i32 : i32, i32, i32
  }
  func.func @transform_2(%arg0: i32, %arg1: i32, %arg2: i32) -> (i32, i32, i32, i32) {
    %c0_i32 = arith.constant 0 : i32
    %c0_i32_0 = arith.constant 0 : i32
    %c0_i32_1 = arith.constant 0 : i32
    return %arg0, %arg1, %c0_i32, %c0_i32_0 : i32, i32, i32, i32
  }
}

</mosaic_0001>

<bundles_post_ra>
// kernel: tpu_custom_call.1
= control target key start
LH: loop header
LB: loop body
LE: loop exit
PB: predicated region body
PF: predicated region fallthrough
CT: control target
= control target key end

     0   :  { %7 = vsyncpa [#allocation3], 0  ;;  %s908_s0 = inlined_call_operand.hbm [shape: f32[2,4,2,128], index: 0, kind: input, shape index: {}]   ;;  %s909_s1 = inlined_call_operand.hbm [shape: s32[2,2,128], index: 1, kind: input, shape index: {}]   ;;  %s910_s2 = inlined_call_operand.hbm [shape: f32[2,1,2,128], index: 2, kind: output, shape index: {}]  }
   0x1   :  { %9 = vsyncpa [#allocation3 + $0x1], 0 }
   0x2   :  { %10 = vsyncpa [#allocation6], 0 }
   0x3   :  { %12 = vsyncpa [#allocation6 + $0x1], 0 }
   0x4   :  { %13 = vsyncpa [#allocation4], 0 }
   0x5   :  { %15 = vsyncpa [#allocation4 + $0x1], 0  ;;  %s687_s9 = smov 0   ;;  %s689_s10 = smov 0  }
   0x6   :  { %s691_s11 = smov 0   ;;  %s693_s12 = smov 0  }
   0x7   :  { %s695_s13 = smov 0   ;;  %s697_s14 = smov 0  }
   0x8 LB: > { %s415_s15 = sadd.s32 4294967295, %s664_s14   ;;  %s416_s16 = sadd.s32 4294967294, %s664_s14   ;;  %s664_s14 = sphi %s697_s14, %s21_s14   ;;  %s660_s13 = sphi %s695_s13, %s929_s13   ;;  %s656_s12 = sphi %s693_s12, %s928_s12   ;;  %s652_s11 = sphi %s691_s11, %s927_s11   ;;  %s648_s10 = sphi %s689_s10, %s926_s10   ;;  %s644_s9 = sphi %s687_s9, %s925_s9  }
   0x9   : > { %s40_s17 = sadd.s32 1, %s660_s13  ;;  %s51_s18 = sadd.s32 1, %s652_s11 }
   0xa   : > { %p42_p0 = scmp.ge.s32.totalorder %s40_s17, 2  ;;  %p58_p1 = scmp.ne.s32.totalorder %s652_s11, %s648_s10 }
   0xb   : > { %p59_p2 = scmp.eq.s32.totalorder %s664_s14, 0  ;;  %p64_p3 = scmp.ne.s32.totalorder %s648_s10, %s644_s9 }
   0xc   : > { %s931_s17 = smov (%p42_p0, %s40_s17), 0  ;;  %p65_p5 = scmp.eq.s32.totalorder %s415_s15, 0 }
   0xd   : > { %p728_p4 = por %p59_p2, %p58_p1  ;;  %s46_s20 = ssub.s32 %s660_s13, %s931_s17 }
   0xe   : > { %p120_p6 = scmp.eq.s32.totalorder %s415_s15, 1  ;;  %p49_p7 = scmp.eq.s32.totalorder %s46_s20, 0 }
   0xf   : > { %p734_p8 = por %p65_p5, %p64_p3  ;;  %p126_p10 = scmp.eq.s32.totalorder %s416_s16, 1 }
  0x10   : > { %p738_p9 = por %p120_p6, %p58_p1  ;;  %p453_p13 = scmp.lt.s32.totalorder %s664_s14, 2 }
  0x11   : > { %s914_s21 = scalar_select %p734_p8, 1, 0 }
  0x12   : > { %s915_s22 = scalar_select %p738_p9, 1, 0 }
  0x13   : > { %s743_s23 = scalar_select %p49_p7, %s652_s11, %s51_s18  }
  0x14   : > { %p745_p11 = por %p126_p10, %p64_p3  ;;  %s752_s25 = sand.u32 1, %s652_s11  }
  0x15   : > { %s419_s26 = sshll.u32 %s752_s25, 3  ;;  %s435_s27 = sshll.u32 %s660_s13, 7 }
  0x16   : > { %s916_s24 = scalar_select %p745_p11, 1, 0 }
  0x17   : > { %s759_s30 = scalar_lea.hbm %s908_s0, %s435_s27  ;;  %s150_s3 = scalar_lea.vmem [#allocation2], %s419_s26 }
  0x18   : > { %s159_s4 = sshll.u32 %s150_s3, 4  ;;  %p765_p0 = pnand %p453_p13, %p728_p4  ;;  %s761_s4 = int_to_ptr.vmem [resolvable:$true] %s159_s4 }
  0x19   : > { %s147_s6 = scalar_lea.sflag [#allocation3], %s752_s25  ;;  %s518_s7 = scalar_lea.hbm %s759_s30, 128 }
  0x1a   : > { %p519_p2 = scmp.ne.s32.totalorder %s759_s30, %s518_s7  ;;  %p520_p3 = pneg %p765_p0 }
  0x1b   : > { %s523_s16 = scalar_lea.hbm %s908_s0, 256  ;;  %p524_p4 = scmp.lt.u32.totalorder %s759_s30, %s908_s0 }
  0x1c   : > { %p521_p5 = pnand %p520_p3, %p519_p2  ;;  %p525_p7 = scmp.lt.u32.totalorder %s523_s16, %s518_s7 }
  0x1d   : > { %p527_p13 = scmp.lt.u32.totalorder %s518_s7, %s759_s30 }
  0x1e   : > { %p522_p6 = pneg %p521_p5  ;;  %p526_p10 = por %p525_p7, %p524_p4 }
  0x20   : > { %p528_p12 = por %p527_p13, %p526_p10 }
  0x22   : > { %p529_p1 = pnand %p528_p12, %p522_p6 }
  0x24   : > { %532 = shalt.err (!%p529_p1)
}
  0x25   : > { %s533_s20 = scalar_lea.vmem %s761_s4, 128  ;;  %s666_s26 = smov [#allocation2]  }
  0x26   : > { %p534_p2 = scmp.ne.s32.totalorder %s761_s4, %s533_s20  ;;  %s538_s27 = sshll.u32 %s666_s26, 4  ;;  %s539_s27 = int_to_ptr.vmem [resolvable:$false] %s538_s27 }
  0x27   : > { %s540_s28 = scalar_lea.vmem %s539_s27, 256  ;;  %p541_p9 = scmp.lt.s32.totalorder %s761_s4, %s539_s27 }
  0x28   : > { %p536_p5 = pnand %p534_p2, %p520_p3  ;;  %p542_p4 = scmp.lt.s32.totalorder %s540_s28, %s533_s20 }
  0x2a   : > { %p537_p11 = pneg %p536_p5  ;;  %p543_p7 = por %p542_p4, %p541_p9 }
  0x2c   : > { %p544_p10 = pnand %p543_p7, %p537_p11 }
  0x2e   : > { %547 = shalt.err (!%p544_p10)
}
  0x2f   : > { %s667_s29 = smov 32   ;;  %s668_s3 = smov 2  }
  0x30   : > { %445 = dma.hbm_to_vmem [thread:$0]  (!%p765_p0), %s759_s30, 128, %s761_s4, %s147_s6, %s667_s29, %s667_s29, %s668_s3  }
  0x31   : > { %p187_p12 = scmp.lt.s32.totalorder %s664_s14, 3  ;;  %s422_s7 = sshll.u32 %s752_s25, 1 }
  0x32   : > { %s423_s8 = sshll.u32 %s660_s13, 5  ;;  %p918_p9 = scmp.ge.s32.totalorder %s664_s14, 1 }
  0x33   : > { %s810_s19 = scalar_lea.hbm %s909_s1, %s423_s8  ;;  %s173_s20 = scalar_lea.vmem [#allocation5], %s422_s7 }
  0x34   : > { %p803_p11 = pnand %p918_p9, %p187_p12  ;;  %s182_s26 = sshll.u32 %s173_s20, 4  ;;  %s183_s26 = int_to_ptr.vmem [resolvable:$true] %s182_s26 }
  0x35   : > { %s170_s30 = scalar_lea.sflag [#allocation6], %s752_s25  ;;  %s548_s4 = scalar_lea.hbm %s810_s19, 32 }
  0x36   : > { %s919_s15 = scalar_select %p803_p11, 1, 0 }
  0x37   : > { %p549_p1 = scmp.ne.s32.totalorder %s810_s19, %s548_s4  ;;  %s553_s28 = scalar_lea.hbm %s909_s1, 64 }
  0x38   : > { %p554_p2 = scmp.lt.u32.totalorder %s810_s19, %s909_s1  ;;  %p555_p5 = scmp.lt.u32.totalorder %s553_s28, %s548_s4 }
  0x39   : > { %p551_p6 = pnand %p549_p1, %p520_p3  ;;  %p557_p7 = scmp.lt.u32.totalorder %s548_s4, %s810_s19 }
  0x3a   : > { %p556_p4 = por %p555_p5, %p554_p2 }
  0x3b   : > { %p552_p13 = pneg %p551_p6 }
  0x3c   : > { %p558_p10 = por %p557_p7, %p556_p4 }
  0x3e   : > { %p559_p12 = pnand %p558_p10, %p552_p13 }
  0x40   : > { %562 = shalt.err (!%p559_p12)
}
  0x41   : > { %s563_s25 = scalar_lea.vmem %s183_s26, 32  ;;  %s669_s7 = smov [#allocation5]  }
  0x42   : > { %p564_p9 = scmp.ne.s32.totalorder %s183_s26, %s563_s25  ;;  %s568_s8 = sshll.u32 %s669_s7, 4  ;;  %s569_s8 = int_to_ptr.vmem [resolvable:$false] %s568_s8 }
  0x43   : > { %s570_s16 = scalar_lea.vmem %s569_s8, 64  ;;  %p571_p8 = scmp.lt.s32.totalorder %s183_s26, %s569_s8 }
  0x44   : > { %p566_p1 = pnand %p564_p9, %p520_p3  ;;  %p572_p11 = scmp.lt.s32.totalorder %s570_s16, %s563_s25 }
  0x46   : > { %p567_p6 = pneg %p566_p1  ;;  %p573_p2 = por %p572_p11, %p571_p8 }
  0x48   : > { %p574_p5 = pnand %p573_p2, %p567_p6 }
  0x4a   : > { %577 = shalt.err (!%p574_p5)
}
  0x4b   : > { %448 = dma.hbm_to_vmem [thread:$0]  (!%p765_p0), %s810_s19, 32, %s183_s26, %s170_s30  }
  0x4c   : > { %p920_p13 = scmp.ne.s32.totalorder %s919_s15, 0 }
  0x4d   : > { %s835_s18 = sand.u32 (!%p920_p13), 1, %s648_s10   ;;  %p921_p3 = scmp.ne.s32.totalorder (!%p920_p13), %s914_s21, 0 }
  0x4e   : > { %191 = sbr.rel (%p920_p13) target bundleno = 157 (0x9d), region = 28  ;;  %s425_s20 = sshll.u32 (!%p920_p13), %s835_s18, 3 }
  0x4f   : > { %s194_s4 = scalar_lea.sflag (!%p920_p13), [#allocation3], %s835_s18  ;;  %s197_s6 = scalar_lea.vmem (!%p920_p13), [#allocation2], %s425_s20 }
  0x55   : > { %631 = dma.done.wait (%p921_p3), %s194_s4, 128  }
  0x56   : > { %633 = vsyncadd (%p921_p3), %s194_s4, 4294967168  ;;  %s426_s5 = sshll.u32 %s835_s18, 1  ;;  %s203_s15 = scalar_lea.sflag [#allocation6], %s835_s18 }
  0x57   : > { %s206_s19 = scalar_lea.vmem [#allocation5], %s426_s5 }
  0x58   : > { %635 = dma.done.wait (%p921_p3), %s203_s15, 32  }
  0x59   : > { %637 = vsyncadd (%p921_p3), %s203_s15, 4294967264  ;;  %s849_s26 = scalar_lea.vmem [#allocation7], %s426_s5  ;;  %v670_v0 = vmov 0.0   ;;  %v240_v1 = vld [vmem:[%s197_s6] sm:$0x3]  ;;  %s432_s21 = sshll.u32 %s656_s12, 5 }
  0x5a   : > { %238 = vst [vmem:[%s849_s26] sm:$0x3] %v670_v0  ;;  %v428_v2 = vld [vmem:[%s197_s6 + $0x2] sm:$0x3]  ;;  %v429_v4 = vld [vmem:[%s197_s6 + $0x4] sm:$0x3]  ;;  %s305_s30 = sshll.u32 %s849_s26, 4  ;;  %s858_s29 = scalar_lea.hbm %s910_s2, %s432_s21  ;;  %s860_s30 = int_to_ptr.vmem [resolvable:$true] %s305_s30 }
  0x5b   : > { %v243_v3 = vmax.f32 %v240_v1, %v428_v2  ;;  %v430_v5 = vld [vmem:[%s197_s6 + $0x6] sm:$0x3]  ;;  %v239_v19 = vld [vmem:[%s206_s19] sm:$0x3]  ;;  %s291_s3 = scalar_lea.sflag [#allocation4], %s835_s18  ;;  %s578_s25 = scalar_lea.vmem %s860_s30, 32 }
  0x5c   : > { %vm254_vm0 = vcmp.eq.s32.totalorder %v239_v19, 0  ;;  %vm261_vm1 = vcmp.eq.s32.totalorder %v239_v19, 1  ;;  %vm268_vm2 = vcmp.eq.s32.totalorder %v239_v19, 2  ;;  %vm275_vm3 = vcmp.eq.s32.totalorder %v239_v19, 3  ;;  %p579_p8 = scmp.ne.s32.totalorder %s860_s30, %s578_s25  ;;  %p922_p0 = scmp.ne.s32.totalorder %s915_s22, 0 }
  0x5d   : > { %v246_v6 = vmax.f32 %v243_v3, %v429_v4  ;;  %s671_s12 = smov [#allocation7]  }
  0x5e   : > { %p580_p11 = pnand %p579_p8, %p922_p0  ;;  %s582_s7 = sshll.u32 %s671_s12, 4  ;;  %s583_s7 = int_to_ptr.vmem [resolvable:$false] %s582_s7 }
  0x5f   : > { %v249_v7 = vmax.f32 %v246_v6, %v430_v5  ;;  %s584_s8 = scalar_lea.vmem %s583_s7, 64  ;;  %p585_p7 = scmp.lt.s32.totalorder %s860_s30, %s583_s7 }
  0x60   : > { %p581_p4 = pneg %p580_p11  ;;  %p586_p10 = scmp.lt.s32.totalorder %s584_s8, %s578_s25 }
  0x61   : > { %v250_v8 = vsub.f32 %v240_v1, %v249_v7  ;;  %v257_v9 = vsub.f32 %v428_v2, %v249_v7  ;;  %v264_v10 = vsub.f32 %v429_v4, %v249_v7  ;;  %v271_v11 = vsub.f32 %v430_v5, %v249_v7  ;;  %v287_v40 = vld [vmem:[%s849_s26] sm:$0x3] }
  0x62   : > { %p587_p12 = por %p586_p10, %p585_p7 }
  0x63   : > { %v251_v12 = vmul.f32 1.442695, %v250_v8  ;;  %v258_v13 = vmul.f32 1.442695, %v257_v9  ;;  %v265_v14 = vmul.f32 1.442695, %v264_v10 }
  0x64   : > { %v272_v15 = vmul.f32 1.442695, %v271_v11  ;;  %v255_v26 = vsel %vm254_vm0, %v250_v8, 0.0  ;;  %p588_p9 = pnand %p587_p12, %p581_p4 }
  0x65   : > { %506 = vpow2.f32 %v251_v12  ;;  %v262_v28 = vsel %vm261_vm1, %v257_v9, %v255_v26 }
  0x66   : > { %508 = vpow2.f32 %v258_v13  ;;  %v269_v31 = vsel %vm268_vm2, %v264_v10, %v262_v28 }
  0x67   : > { %510 = vpow2.f32 %v265_v14  ;;  %v276_v35 = vsel %vm275_vm3, %v271_v11, %v269_v31 }
  0x68   : > { %512 = vpow2.f32 %v272_v15 }
  0x6f   : > { %v507_v16 = vpop.eup %506 }
  0x70   : > { %v509_v17 = vpop.eup %508  ;;  %v256_v24 = vsel %vm254_vm0, %v507_v16, 0.0 }
  0x71   : > { %v511_v18 = vpop.eup %510  ;;  %v260_v20 = vadd.f32 %v509_v17, %v507_v16  ;;  %v263_v25 = vsel %vm261_vm1, %v509_v17, %v256_v24 }
  0x72   : > { %v513_v21 = vpop.eup %512  ;;  %v270_v27 = vsel %vm268_vm2, %v511_v18, %v263_v25 }
  0x73   : > { %v267_v22 = vadd.f32 %v511_v18, %v260_v20  ;;  %v277_v29 = vsel %vm275_vm3, %v513_v21, %v270_v27 }
  0x75   : > { %v274_v23 = vadd.f32 %v513_v21, %v267_v22 }
  0x77   : > { %514 = vlog2.f32 %v274_v23 }
  0x78   : > { %516 = vrcp.f32 %v274_v23 }
  0x81   : > { %v515_v30 = vpop.eup %514 }
  0x82   : > { %v517_v32 = vpop.eup %516  ;;  %v279_v33 = vmul.f32 0.6931472, %v515_v30 }
  0x83   : > { %v282_v34 = vmul.f32 %v517_v32, %v277_v29 }
  0x84   : > { %v280_v37 = vsub.f32 %v276_v35, %v279_v33 }
  0x85   : > { %v283_v36 = vsub.f32 1.0, %v282_v34 }
  0x87   : > { %v284_v38 = vmul.f32 %v283_v36, %v283_v36 }
  0x89   : > { %v285_v39 = vsub.f32 0.0, %v284_v38 }
  0x8b   : > { %v286_v41 = vmul.f32 %v285_v39, %v280_v37 }
  0x8d   : > { %v288_v42 = vadd.f32 %v287_v40, %v286_v41 }
  0x8f   : > { %289 = vst [vmem:[%s849_s26] sm:$0x3] %v288_v42 }
  0x90   : > { %591 = shalt.err (!%p588_p9)
}
  0x91   : > { %s592_s16 = scalar_lea.hbm %s858_s29, 32  ;;  %s596_s4 = scalar_lea.hbm %s910_s2, 64 }
  0x92   : > { %p593_p1 = scmp.ne.s32.totalorder %s858_s29, %s592_s16  ;;  %p597_p5 = scmp.lt.u32.totalorder %s858_s29, %s910_s2 }
  0x93   : > { %p598_p13 = scmp.lt.u32.totalorder %s596_s4, %s592_s16  ;;  %p600_p8 = scmp.lt.u32.totalorder %s592_s16, %s858_s29 }
  0x94   : > { %p594_p6 = pnand %p593_p1, %p922_p0 }
  0x95   : > { %p599_p3 = por %p598_p13, %p597_p5 }
  0x96   : > { %p595_p2 = pneg %p594_p6 }
  0x97   : > { %p601_p11 = por %p600_p8, %p599_p3 }
  0x99   : > { %p602_p4 = pnand %p601_p11, %p595_p2 }
  0x9b   : > { %605 = shalt.err (!%p602_p4)
}
  0x9c   : > { %440 = dma.vmem_to_hbm [thread:$0]  (%p922_p0), %s860_s30, 32, %s858_s29, %s291_s3  }
  0x9d PF: > { %s317_s15 = sand.u32 1, %s644_s9   ;;  %p923_p7 = scmp.ne.s32.totalorder %s916_s24, 0 }
  0x9e   : > { %p924_p10 = scmp.ge.s32.totalorder %s664_s14, 2  ;;  %s318_s19 = scalar_lea.sflag [#allocation4], %s317_s15 }
  0xa0   : > { %p450_p12 = pnand %p924_p10, %p923_p7 }
  0xa2   : > { %639 = dma.done.wait (!%p450_p12), %s318_s19, 32  }
  0xa3   : > { %641 = vsyncadd (!%p450_p12), %s318_s19, 4294967264  ;;  %s21_s14 = sadd.s32 1, %s664_s14   ;;  %s925_s9 = smov %s648_s10 }
  0xa4   : > { %p18_p9 = scmp.ge.s32.totalorder %s21_s14, 4   ;;  %s926_s10 = smov %s652_s11 }
  0xa5   : > { %s927_s11 = smov %s743_s23  ;;  %s928_s12 = smov %s660_s13 }
  0xa6   : > { %s929_s13 = smov %s931_s17  ;;  %20 = sbr.rel (!%p18_p9) target bundleno = 8 (0x8), region = 93 }
  0xad   :  { %323 = vsyncpa [#allocation3], 1 }
  0xae   :  { %325 = vsyncpa [#allocation3 + $0x1], 1 }
  0xaf   :  { %326 = vsyncpa [#allocation6], 1 }
  0xb0   :  { %328 = vsyncpa [#allocation6 + $0x1], 1 }
  0xb1   :  { %329 = vsyncpa [#allocation4], 1 }
  0xb2   :  { %331 = vsyncpa [#allocation4 + $0x1], 1 }

</bundles_post_ra>
